<compile_context>
chip_gen: v7x
topology: tpu7x:2x2x1
jax: 0.10.0
libtpu: 0.0.40
codegen_flags: <defaults>
</compile_context>

<pallas_src>
from functools import partial

import numpy as np
import jax
import jax.numpy as jnp
from jax.experimental import pallas as pl
from jax.experimental.pallas import tpu as pltpu


def _round_up(x, m):
    return ((x + m - 1) // m) * m


# ---------------------------------------------------------------------------
# Pallas kernel: one (tm, tn) tile of  spikes_ex_out = spikes_ex + spikes @ W
# ---------------------------------------------------------------------------
def projection_kernel(spikes_ref, weight_ref, spikes_ex_ref, spikes_ex_out_ref):
    # MXU matmul, accumulated in f32.
    current = jnp.dot(spikes_ref[...], weight_ref[...],
                      preferred_element_type=jnp.float32)
    # Accumulate into the post population's excitatory input (f32 add on VPU).
    spikes_ex_out_ref[...] = (
        spikes_ex_ref[...].astype(jnp.float32) + current
    ).astype(spikes_ex_out_ref.dtype)


@partial(jax.jit,
         static_argnames=("compute_dtype", "tile_m", "tile_n"),
         donate_argnums=(2,))
def projection_forward(weighted_spikes, connect_mat, spikes_ex, *,
                       compute_dtype=None, tile_m=256, tile_n=512):
    """Projection forward pass.

    weighted_spikes : [M, N_pre] or [T, B, N_pre]  (leading dims are flattened)
    connect_mat     : [N_pre, N_post]
    spikes_ex       : [M, N_post] or [T, B, N_post] (same leading dims; donated)

    Returns (delta_w, new_spikes_ex) — matching `spikes_ex += spikes @ weight`.
    """
    out_shape_orig = spikes_ex.shape
    if weighted_spikes.ndim > 2:
        weighted_spikes = weighted_spikes.reshape(-1, weighted_spikes.shape[-1])
        spikes_ex = spikes_ex.reshape(-1, spikes_ex.shape[-1])

    M, K = weighted_spikes.shape
    K2, N = connect_mat.shape
    assert K == K2, (K, K2)
    assert spikes_ex.shape == (M, N), (spikes_ex.shape, (M, N))

    in_dtype = compute_dtype if compute_dtype is not None else weighted_spikes.dtype
    spikes = weighted_spikes.astype(in_dtype)
    weight = connect_mat.astype(in_dtype)

    # Tile sizes: last dim a multiple of 128, second-minor a multiple of 8
    # (or the full dim), capped at (tile_m, tile_n).  K is kept whole so the
    # weight tile can stay VMEM-resident across M tiles.
    tm = min(tile_m, _round_up(M, 8))
    tn = min(tile_n, _round_up(N, 128))
    Mp = _round_up(M, tm)
    Np = _round_up(N, tn)

    pad_m, pad_n = Mp - M, Np - N
    if pad_m:
        spikes = jnp.pad(spikes, ((0, pad_m), (0, 0)))
    if pad_n:
        weight = jnp.pad(weight, ((0, 0), (0, pad_n)))
    spikes_ex_p = spikes_ex
    if pad_m or pad_n:
        spikes_ex_p = jnp.pad(spikes_ex, ((0, pad_m), (0, pad_n)))

    n_blocks, m_blocks = Np // tn, Mp // tm

    # Grid = (N_post tiles, M tiles); M is the fast (innermost) axis.  The
    # weight index_map ignores `m`, so its VMEM block is reused (not re-DMA'd)
    # across every M tile for a given N tile.
    grid_spec = pl.GridSpec(
        grid=(n_blocks, m_blocks),
        in_specs=[
            pl.BlockSpec((tm, K), lambda n, m: (m, 0)),   # weighted spikes
            pl.BlockSpec((K, tn), lambda n, m: (0, n)),   # weight (resident over m)
            pl.BlockSpec((tm, tn), lambda n, m: (m, n)),  # spikes_ex (aliased)
        ],
        out_specs=pl.BlockSpec((tm, tn), lambda n, m: (m, n)),
    )

    new_spikes_ex = pl.pallas_call(
        projection_kernel,
        out_shape=jax.ShapeDtypeStruct((Mp, Np), spikes_ex.dtype),
        grid_spec=grid_spec,
        input_output_aliases={2: 0},   # accumulate in-place into spikes_ex
        compiler_params=pltpu.CompilerParams(
            dimension_semantics=("parallel", "parallel")),
    )(spikes, weight, spikes_ex_p)

    if pad_m or pad_n:
        new_spikes_ex = new_spikes_ex[:M, :N]
    new_spikes_ex = new_spikes_ex.reshape(out_shape_orig)

    delta_w = 0.0  # learning=False -> no STDP update
    return delta_w, new_spikes_ex


# ---------------------------------------------------------------------------
# Deterministic parameter construction (mirrors Projection.connection_matrix)
# ---------------------------------------------------------------------------
def make_connection_matrix(key, num_pre, num_post, sparse_ratio=0.5,
                           ex_inh_type="excitatory"):
    k_rand, k_pre, k_pos = jax.random.split(key, 3)
    connect = jax.random.uniform(k_rand, (num_pre, num_post), dtype=jnp.float32)
    if ex_inh_type != "excitatory":
        connect = -1.0 * connect
    n_keep_pre = int(np.ceil(num_pre * sparse_ratio))
    n_keep_pos = int(np.ceil(num_post * sparse_ratio))
    pre_keep = jax.random.permutation(k_pre, num_pre)[:n_keep_pre]
    pos_keep = jax.random.permutation(k_pos, num_post)[:n_keep_pos]
    row_mask = jnp.zeros((num_pre,), jnp.float32).at[pre_keep].set(1.0)
    col_mask = jnp.zeros((num_post,), jnp.float32).at[pos_keep].set(1.0)
    return connect * row_mask[:, None] * col_mask[None, :]


if __name__ == "__main__":
    key = jax.random.PRNGKey(0)
    k_cm, k_spk, k_ex = jax.random.split(key, 3)

    # 16 stacked timesteps of batch 8 -> M = 128 rows feed the MXU per call.
    T, B = 16, 8
    N_PRE, N_POST = 32, 128

    connect_mat = make_connection_matrix(k_cm, N_PRE, N_POST, sparse_ratio=0.5,
                                         ex_inh_type="excitatory")
    weighted_spikes = jax.random.uniform(k_spk, (T, B, N_PRE), dtype=jnp.float32)
    spikes_ex = jax.random.normal(k_ex, (T, B, N_POST), dtype=jnp.float32)

    # Host copies for the reference check (spikes_ex is donated to the kernel).
    ws_np = np.asarray(weighted_spikes)
    se_np = np.asarray(spikes_ex)
    cm_np = np.asarray(connect_mat)

    delta_w, new_spikes_ex = projection_forward(weighted_spikes, connect_mat,
                                                spikes_ex)
    new_spikes_ex = jax.block_until_ready(new_spikes_ex)

    # Plain-numpy reference: spikes_ex += weighted_spikes @ connect_mat (per row).
    ref = se_np.reshape(-1, N_POST) + ws_np.reshape(-1, N_PRE) @ cm_np
    ref = ref.reshape(T, B, N_POST)
    np.testing.assert_allclose(np.asarray(new_spikes_ex), ref,
                               rtol=1e-5, atol=1e-5)
    assert float(delta_w) == 0.0

    print("KERNEL_OK")
</pallas_src>

<mosaic_0001>
module attributes {stable_mosaic.version = 11 : i64} {
  func.func @projection_kernel(%arg0: i32, %arg1: i32, %arg2: memref<128x32xf32, #tpu.memory_space<vmem>>, %arg3: memref<32x128xf32, #tpu.memory_space<vmem>>, %arg4: memref<128x128xf32, #tpu.memory_space<vmem>>, %arg5: memref<128x128xf32, #tpu.memory_space<vmem>>) attributes {dimension_semantics = [#tpu.dimension_semantics<parallel>, #tpu.dimension_semantics<parallel>], iteration_bounds = array<i64: 1, 1>, scalar_prefetch = 0 : i64, scratch_operands = 0 : i64, tpu.core_type = #tpu.core_type<tc>, window_params = [{transform_indices = @transform_0, window_bounds = array<i64: 128, 32>}, {transform_indices = @transform_1, window_bounds = array<i64: 32, 128>}, {transform_indices = @transform_2, window_bounds = array<i64: 128, 128>}, {transform_indices = @transform_3, window_bounds = array<i64: 128, 128>}]} {
    %c0 = arith.constant 0 : index
    %c0_0 = arith.constant 0 : index
    %0 = vector.load %arg2[%c0, %c0_0] : memref<128x32xf32, #tpu.memory_space<vmem>>, vector<128x32xf32>
    %c0_1 = arith.constant 0 : index
    %c0_2 = arith.constant 0 : index
    %1 = vector.load %arg3[%c0_1, %c0_2] : memref<32x128xf32, #tpu.memory_space<vmem>>, vector<32x128xf32>
    %cst = arith.constant dense<0.000000e+00> : vector<128x128xf32>
    %2 = tpu.matmul %0, %1, %cst {dimension_numbers = #tpu.dot_dimension_numbers<[1], [0], [0], [1], [0, 0, 1, 1], [], []>} : vector<128x32xf32>, vector<32x128xf32>, vector<128x128xf32> -> vector<128x128xf32>
    %c0_3 = arith.constant 0 : index
    %c0_4 = arith.constant 0 : index
    %3 = vector.load %arg4[%c0_3, %c0_4] : memref<128x128xf32, #tpu.memory_space<vmem>>, vector<128x128xf32>
    %4 = arith.addf %3, %2 : vector<128x128xf32>
    %c0_5 = arith.constant 0 : index
    %c0_6 = arith.constant 0 : index
    %5 = vector.load %arg5[%c0_5, %c0_6] : memref<128x128xf32, #tpu.memory_space<vmem>>, vector<128x128xf32>
    tpu.vector_store %arg5[%c0_5, %c0_6], %4 {strides = array<i32>} : memref<128x128xf32, #tpu.memory_space<vmem>>, vector<128x128xf32>,
    return
  }
  func.func @transform_0(%arg0: i32, %arg1: i32) -> (i32, i32) {
    %c0_i32 = arith.constant 0 : i32
    %c0_i32_0 = arith.constant 0 : i32
    return %arg1, %c0_i32 : i32, i32
  }
  func.func @transform_1(%arg0: i32, %arg1: i32) -> (i32, i32) {
    %c0_i32 = arith.constant 0 : i32
    %c0_i32_0 = arith.constant 0 : i32
    return %c0_i32, %arg0 : i32, i32
  }
  func.func @transform_2(%arg0: i32, %arg1: i32) -> (i32, i32) {
    %c0_i32 = arith.constant 0 : i32
    return %arg1, %arg0 : i32, i32
  }
  func.func @transform_3(%arg0: i32, %arg1: i32) -> (i32, i32) {
    %c0_i32 = arith.constant 0 : i32
    return %arg1, %arg0 : i32, i32
  }
}

</mosaic_0001>

<bundles_post_ra>
// kernel: projection_forward.1
= control target key start
LH: loop header
LB: loop body
LE: loop exit
PB: predicated region body
PF: predicated region fallthrough
CT: control target
= control target key end

     0   :  { %8 = vsyncpa [#allocation3], 0  ;;  %s625_s0 = inlined_call_operand.hbm [shape: f32[128,32], index: 0, kind: input, shape index: {}]   ;;  %s626_s1 = inlined_call_operand.hbm [shape: f32[32,128], index: 1, kind: input, shape index: {}]   ;;  %s627_s2 = inlined_call_operand.hbm [shape: f32[128,128], index: 2, kind: input, shape index: {}, may-alias: {2,3}]   ;;  %s628_s3 = inlined_call_operand.hbm [shape: f32[128,128], index: 3, kind: output, shape index: {}, may-alias: {2,3}]  }
   0x1   :  { %9 = vsyncpa [#allocation6], 0 }
   0x2   :  { %10 = vsyncpa [#allocation4], 0  ;;  %s516_s12 = smov [#allocation5]   ;;  %s517_s14 = smov [#allocation2]  }
   0x3   :  { %s28_s13 = sshll.u32 %s516_s12, 4  ;;  %s16_s15 = sshll.u32 %s517_s14, 4  ;;  %s29_s13 = int_to_ptr.vmem [resolvable:$true] %s28_s13  ;;  %s542_s15 = int_to_ptr.vmem [resolvable:$true] %s16_s15 }
   0x4   :  { %s422_s18 = scalar_lea.hbm %s626_s1, 512 }
   0x5   :  { %p423_p0 = scmp.ne.s32.totalorder %s626_s1, %s422_s18  ;;  %p426_p1 = scmp.lt.u32.totalorder %s422_s18, %s626_s1 }
   0x7   :  { %p428_p2 = pnand %p426_p1, %p423_p0 }
   0x9   :  { %431 = shalt.err (!%p428_p2)
}
   0xa   :  { %s432_s23 = scalar_lea.vmem %s29_s13, 512  ;;  %p437_p4 = scmp.lt.s32.totalorder %s29_s13, %s29_s13 }
   0xb   :  { %p433_p3 = scmp.ne.s32.totalorder %s29_s13, %s432_s23  ;;  %p438_p5 = scmp.lt.s32.totalorder %s432_s23, %s432_s23 }
   0xd   :  { %p439_p6 = por %p438_p5, %p437_p4 }
   0xf   :  { %p440_p7 = pnand %p439_p6, %p433_p3 }
  0x11   :  { %443 = shalt.err (!%p440_p7)
}
  0x12   :  { %s518_s24 = smov 128   ;;  %s519_s25 = smov 8  }
  0x13   :  { %34 = dma.hbm_to_vmem [thread:$0]  %s626_s1, 512, %s29_s13, [#allocation6], %s518_s24, %s518_s24, %s519_s25  }
  0x14   :  { %s444_s30 = scalar_lea.hbm %s625_s0, 2048 }
  0x15   :  { %p445_p8 = scmp.ne.s32.totalorder %s625_s0, %s444_s30  ;;  %p448_p9 = scmp.lt.u32.totalorder %s444_s30, %s625_s0 }
  0x17   :  { %p450_p10 = pnand %p448_p9, %p445_p8 }
  0x19   :  { %453 = shalt.err (!%p450_p10)
}
  0x1a   :  { %s454_s8 = scalar_lea.vmem %s542_s15, 2048  ;;  %p459_p12 = scmp.lt.s32.totalorder %s542_s15, %s542_s15 }
  0x1b   :  { %p455_p11 = scmp.ne.s32.totalorder %s542_s15, %s454_s8  ;;  %p460_p13 = scmp.lt.s32.totalorder %s454_s8, %s454_s8 }
  0x1d   :  { %p461_p0 = por %p460_p13, %p459_p12 }
  0x1f   :  { %p462_p1 = pnand %p461_p0, %p455_p11 }
  0x21   :  { %465 = shalt.err (!%p462_p1)
}
  0x22   :  { %22 = dma.hbm_to_vmem [thread:$0]  %s625_s0, 2048, %s542_s15, [#allocation3], %s518_s24, %s518_s24, %s519_s25  }
  0x23   :  { %s520_s10 = smov [#allocation7]   ;;  %s466_s14 = scalar_lea.hbm %s627_s2, 2048 }
  0x24   :  { %s40_s11 = sshll.u32 %s520_s10, 4  ;;  %p467_p2 = scmp.ne.s32.totalorder %s627_s2, %s466_s14  ;;  %s41_s11 = int_to_ptr.vmem [resolvable:$true] %s40_s11 }
  0x25   :  { %p470_p3 = scmp.lt.u32.totalorder %s466_s14, %s627_s2 }
  0x27   :  { %p472_p4 = pnand %p470_p3, %p467_p2 }
  0x29   :  { %475 = shalt.err (!%p472_p4)
}
  0x2a   :  { %s476_s20 = scalar_lea.vmem %s41_s11, 2048  ;;  %p481_p6 = scmp.lt.s32.totalorder %s41_s11, %s41_s11 }
  0x2b   :  { %p477_p5 = scmp.ne.s32.totalorder %s41_s11, %s476_s20  ;;  %p482_p7 = scmp.lt.s32.totalorder %s476_s20, %s476_s20 }
  0x2d   :  { %p483_p8 = por %p482_p7, %p481_p6 }
  0x2f   :  { %p484_p9 = pnand %p483_p8, %p477_p5 }
  0x31   :  { %487 = shalt.err (!%p484_p9)
}
  0x32   :  { %46 = dma.hbm_to_vmem [thread:$0]  %s627_s2, 2048, %s41_s11, [#allocation6], %s518_s24, %s518_s24, %s519_s25  }
  0x33   :  { %510 = dma.done.wait [#allocation3], 2048  }
  0x34   :  { %511 = vsyncadd [#allocation3], 4294965248 }
  0x35   :  { %512 = dma.done.wait [#allocation6], 2560  }
  0x36   :  { %513 = vsyncadd [#allocation6], 4294964736  ;;  %vm76_vm0 = vcmask 261120   ;;  %v72_v0 = vld [vmem:[#allocation5] sm:$0xff]  ;;  %v73_v1 = vld [vmem:[#allocation5 + $0x8] sm:$0xff]  ;;  %s521_s2 = smov [#allocation8]  }
  0x37   :  { %v74_v2 = vld [vmem:[#allocation5 + $0x10] sm:$0xff]  ;;  %v404_v3 = vpack.c.bf16 %v73_v1, %v72_v0  ;;  %v75_v4 = vld [vmem:[#allocation5 + $0x18] sm:$0xff]  ;;  %v56_v5 = vld [vmem:[#allocation2] sm:$0xff]  ;;  %s323_s21 = sshll.u32 %s521_s2, 4  ;;  %s324_s21 = int_to_ptr.vmem [resolvable:$true] %s323_s21 }
  0x38   :  { %v64_v6 = vld [vmem:[#allocation2 + $0x40] sm:$0xff]  ;;  %v408_v7 = vpack.c.bf16 %v75_v4, %v74_v2  ;;  %380 = vmatprep.mubr.msk.f32.mxu0 %vm76_vm0, %v56_v5  ;;  %v57_v8 = vld [vmem:[#allocation2 + $0x8] sm:$0xff]  ;;  %v58_v10 = vld [vmem:[#allocation2 + $0x10] sm:$0xff]  ;;  %s488_s22 = scalar_lea.vmem %s324_s21, 2048  ;;  %p493_p11 = scmp.lt.s32.totalorder %s324_s21, %s324_s21 }
  0x39   :  { %392 = vmatprep.mubr.msk.f32.mxu1 %vm76_vm0, %v64_v6  ;;  %405 = vmatprep.subr.bf16.mxu0 %v404_v3  ;;  %v65_v9 = vld [vmem:[#allocation2 + $0x48] sm:$0xff]  ;;  %v66_v11 = vld [vmem:[#allocation2 + $0x50] sm:$0xff]  ;;  %v59_v12 = vld [vmem:[#allocation2 + $0x18] sm:$0xff]  ;;  %p489_p10 = scmp.ne.s32.totalorder %s324_s21, %s488_s22  ;;  %p494_p12 = scmp.lt.s32.totalorder %s488_s22, %s488_s22 }
  0x3a   :  { %412 = vmatprep.subr.bf16.mxu1 %v404_v3  ;;  %407 = vmatpush3.bf16.msra.mxu0 %v404_v3  ;;  %v67_v13 = vld [vmem:[#allocation2 + $0x58] sm:$0xff]  ;;  %v60_v14 = vld [vmem:[#allocation2 + $0x20] sm:$0xff]  ;;  %v61_v16 = vld [vmem:[#allocation2 + $0x28] sm:$0xff] }
  0x3b   :  { %414 = vmatpush3.bf16.msra.mxu1 %v404_v3  ;;  %409 = vmatprep.subr.bf16.mxu0 %v408_v7  ;;  %v68_v15 = vld [vmem:[#allocation2 + $0x60] sm:$0xff]  ;;  %v69_v17 = vld [vmem:[#allocation2 + $0x68] sm:$0xff]  ;;  %v62_v18 = vld [vmem:[#allocation2 + $0x30] sm:$0xff]  ;;  %p495_p13 = por %p494_p12, %p493_p11 }
  0x3c   :  { %413 = vmatprep.subr.bf16.mxu1 %v408_v7  ;;  %v70_v19 = vld [vmem:[#allocation2 + $0x70] sm:$0xff]  ;;  %v63_v20 = vld [vmem:[#allocation2 + $0x38] sm:$0xff]  ;;  %v271_v22 = vld [vmem:[#allocation7 + $0x8] sm:$0xff] }
  0x3d   :  { %v71_v21 = vld [vmem:[#allocation2 + $0x78] sm:$0xff]  ;;  %v279_v23 = vld [vmem:[#allocation7 + $0x48] sm:$0xff]  ;;  %v270_v24 = vld [vmem:[#allocation7] sm:$0xff]  ;;  %p496_p0 = pnand %p495_p13, %p489_p10 }
  0x3e   :  { %411 = vmatpush3.bf16.msra.mxu0 %v408_v7  ;;  %v278_v25 = vld [vmem:[#allocation7 + $0x40] sm:$0xff]  ;;  %v273_v34 = vld [vmem:[#allocation7 + $0x18] sm:$0xff]  ;;  %v272_v36 = vld [vmem:[#allocation7 + $0x10] sm:$0xff] }
  0x3f   :  { %415 = vmatpush3.bf16.msra.mxu1 %v408_v7  ;;  %v281_v35 = vld [vmem:[#allocation7 + $0x58] sm:$0xff]  ;;  %v280_v37 = vld [vmem:[#allocation7 + $0x50] sm:$0xff]  ;;  %v275_v46 = vld [vmem:[#allocation7 + $0x28] sm:$0xff] }
  0x40   :  { %v283_v47 = vld [vmem:[#allocation7 + $0x68] sm:$0xff]  ;;  %v274_v48 = vld [vmem:[#allocation7 + $0x20] sm:$0xff]  ;;  %v277_v58 = vld [vmem:[#allocation7 + $0x38] sm:$0xff] }
  0x41   :  { %381 = vmatmul.mubr.msk.f32.vlgmr.msra.gmra.mrb[0].mxu0 %vm76_vm0, %v57_v8  ;;  %v282_v49 = vld [vmem:[#allocation7 + $0x60] sm:$0xff]  ;;  %v285_v59 = vld [vmem:[#allocation7 + $0x78] sm:$0xff]  ;;  %v276_v60 = vld [vmem:[#allocation7 + $0x30] sm:$0xff] }
  0x42   :  { %393 = vmatmul.mubr.msk.f32.vlgmr.msra.gmra.mrb[0].mxu1 %vm76_vm0, %v65_v9  ;;  %383 = vmatprep.mubr.msk.f32.mxu0 %vm76_vm0, %v58_v10  ;;  %v284_v61 = vld [vmem:[#allocation7 + $0x70] sm:$0xff] }
  0x43   :  { %395 = vmatprep.mubr.msk.f32.mxu1 %vm76_vm0, %v66_v11 }
  0x45   :  { %384 = vmatmul.mubr.msk.f32.gmra.mrb[2].mxu0 %vm76_vm0, %v59_v12 }
  0x46   :  { %396 = vmatmul.mubr.msk.f32.gmra.mrb[2].mxu1 %vm76_vm0, %v67_v13  ;;  %386 = vmatprep.mubr.msk.f32.mxu0 %vm76_vm0, %v60_v14 }
  0x47   :  { %398 = vmatprep.mubr.msk.f32.mxu1 %vm76_vm0, %v68_v15 }
  0x49   :  { %387 = vmatmul.mubr.msk.f32.gmra.mrb[4].mxu0 %vm76_vm0, %v61_v16 }
  0x4a   :  { %399 = vmatmul.mubr.msk.f32.gmra.mrb[4].mxu1 %vm76_vm0, %v69_v17  ;;  %389 = vmatprep.mubr.msk.f32.mxu0 %vm76_vm0, %v62_v18 }
  0x4b   :  { %401 = vmatprep.mubr.msk.f32.mxu1 %vm76_vm0, %v70_v19 }
  0x4d   :  { %390 = vmatmul.mubr.msk.f32.gmra.mrb[6].mxu0 %vm76_vm0, %v63_v20 }
  0x4e   :  { %402 = vmatmul.mubr.msk.f32.gmra.mrb[6].mxu1 %vm76_vm0, %v71_v21 }
 0x114   :  { %v382_v26 = vpop.f32.mrb[0].mxu0 }
 0x115   :  { %v394_v27 = vpop.f32.mrb[0].mxu1  ;;  %v287_v28 = vadd.f32 %v382_v26, %v271_v22  ;;  %v191_v30 = vpop.f32.mrb[1].mxu0 }
 0x116   :  { %v295_v29 = vadd.f32 %v394_v27, %v279_v23  ;;  %v231_v31 = vpop.f32.mrb[1].mxu1  ;;  %v286_v32 = vadd.f32 %v270_v24, %v191_v30 }
 0x117   :  { %v294_v33 = vadd.f32 %v278_v25, %v231_v31  ;;  %303 = vst [vmem:[#allocation8 + $0x8] sm:$0xff] %v287_v28 }
 0x118   :  { %311 = vst [vmem:[#allocation8 + $0x48] sm:$0xff] %v295_v29  ;;  %302 = vst [vmem:[#allocation8] sm:$0xff] %v286_v32  ;;  %v385_v38 = vpop.f32.mrb[2].mxu0 }
 0x119   :  { %310 = vst [vmem:[#allocation8 + $0x40] sm:$0xff] %v294_v33  ;;  %v397_v39 = vpop.f32.mrb[2].mxu1  ;;  %v289_v40 = vadd.f32 %v385_v38, %v273_v34  ;;  %v201_v42 = vpop.f32.mrb[3].mxu0 }
 0x11a   :  { %v297_v41 = vadd.f32 %v397_v39, %v281_v35  ;;  %v241_v43 = vpop.f32.mrb[3].mxu1  ;;  %v288_v44 = vadd.f32 %v272_v36, %v201_v42 }
 0x11b   :  { %v296_v45 = vadd.f32 %v280_v37, %v241_v43  ;;  %305 = vst [vmem:[#allocation8 + $0x18] sm:$0xff] %v289_v40 }
 0x11c   :  { %313 = vst [vmem:[#allocation8 + $0x58] sm:$0xff] %v297_v41  ;;  %304 = vst [vmem:[#allocation8 + $0x10] sm:$0xff] %v288_v44  ;;  %v388_v50 = vpop.f32.mrb[4].mxu0 }
 0x11d   :  { %312 = vst [vmem:[#allocation8 + $0x50] sm:$0xff] %v296_v45  ;;  %v400_v51 = vpop.f32.mrb[4].mxu1  ;;  %v291_v52 = vadd.f32 %v388_v50, %v275_v46  ;;  %v211_v54 = vpop.f32.mrb[5].mxu0 }
 0x11e   :  { %v299_v53 = vadd.f32 %v400_v51, %v283_v47  ;;  %v251_v55 = vpop.f32.mrb[5].mxu1  ;;  %v290_v56 = vadd.f32 %v274_v48, %v211_v54 }
 0x11f   :  { %v298_v57 = vadd.f32 %v282_v49, %v251_v55  ;;  %307 = vst [vmem:[#allocation8 + $0x28] sm:$0xff] %v291_v52 }
 0x120   :  { %315 = vst [vmem:[#allocation8 + $0x68] sm:$0xff] %v299_v53  ;;  %306 = vst [vmem:[#allocation8 + $0x20] sm:$0xff] %v290_v56  ;;  %v391_v62 = vpop.f32.mrb[6].mxu0 }
 0x121   :  { %314 = vst [vmem:[#allocation8 + $0x60] sm:$0xff] %v298_v57  ;;  %v403_v63 = vpop.f32.mrb[6].mxu1  ;;  %v293_v0 = vadd.f32 %v391_v62, %v277_v58  ;;  %v221_v2 = vpop.f32.mrb[7].mxu0 }
 0x122   :  { %v301_v1 = vadd.f32 %v403_v63, %v285_v59  ;;  %v261_v3 = vpop.f32.mrb[7].mxu1  ;;  %v292_v4 = vadd.f32 %v276_v60, %v221_v2 }
 0x123   :  { %v300_v5 = vadd.f32 %v284_v61, %v261_v3  ;;  %309 = vst [vmem:[#allocation8 + $0x38] sm:$0xff] %v293_v0 }
 0x124   :  { %317 = vst [vmem:[#allocation8 + $0x78] sm:$0xff] %v301_v1  ;;  %308 = vst [vmem:[#allocation8 + $0x30] sm:$0xff] %v292_v4 }
 0x125   :  { %316 = vst [vmem:[#allocation8 + $0x70] sm:$0xff] %v300_v5 }
 0x126   :  { %499 = shalt.err (!%p496_p0)
}
 0x127   :  { %s500_s27 = scalar_lea.hbm %s628_s3, 2048 }
 0x128   :  { %p501_p1 = scmp.ne.s32.totalorder %s628_s3, %s500_s27  ;;  %p504_p2 = scmp.lt.u32.totalorder %s500_s27, %s628_s3 }
 0x12a   :  { %p506_p3 = pnand %p504_p2, %p501_p1 }
 0x12c   :  { %509 = shalt.err (!%p506_p3)
}
 0x12d   :  { %329 = dma.vmem_to_hbm [thread:$0]  %s324_s21, 2048, %s628_s3, [#allocation4], %s518_s24, %s518_s24, %s519_s25  }
 0x12e   :  { %514 = dma.done.wait [#allocation4], 2048  }
 0x12f   :  { %515 = vsyncadd [#allocation4], 4294965248 }
 0x130   :  { %333 = vsyncpa [#allocation3], 1 }
 0x131   :  { %334 = vsyncpa [#allocation6], 1 }
 0x132   :  { %335 = vsyncpa [#allocation4], 1 }

</bundles_post_ra>
